<compile_context>
chip_gen: v6e
topology: v6e:2x2x1
jax: 0.10.0
libtpu: 0.0.40
codegen_flags: <defaults>
</compile_context>

<pallas_src>
import jax
import jax.numpy as jnp
from jax.experimental import pallas as pl
from jax.experimental.pallas import tpu as pltpu

LANE = 128


def _abs_diff_partial_kernel(o_ref, t_ref, acc_ref):
    # acc_ref is an (8, 128) f32 partial-sum block, resident across grid axis 1.
    @pl.when(pl.program_id(1) == 0)
    def _():
        acc_ref[...] = jnp.zeros_like(acc_ref)

    diff = o_ref[...].astype(jnp.float32) - t_ref[...].astype(jnp.float32)
    a = jnp.abs(diff)  # == sqrt(diff^2) elementwise; VPU bit-op instead of EUP sqrt
    tr = a.shape[0]
    # Collapse the (tile_rows, 128) tile into (8, 128) with pure vreg adds
    # (reshape splits exactly at vreg boundaries -> free relayout).
    acc_ref[...] += jnp.sum(a.reshape(tr // 8, 8, LANE), axis=0)


def _default_num_split():
    """2 on multi-TensorCore chips (v7x), 1 on single-TC chips (v5e/v6e)."""
    try:
        kind = jax.devices()[0].device_kind.lower()
    except Exception:
        return 1
    return 2 if ("v7" in kind or "7x" in kind) else 1


def euclidian_loss(output, target, *, tile_rows=8192, num_split=None):
    """Sum of elementwise |output - target| via a Pallas TPU streaming reduction."""
    assert output.shape == target.shape, "output/target shapes must match"

    if num_split is None:
        num_split = _default_num_split()
    num_split = max(1, int(num_split))

    o_flat = output.reshape(-1)  # free for contiguous arrays
    t_flat = target.reshape(-1)
    n = int(o_flat.shape[0])

    itemsize_o = jnp.dtype(output.dtype).itemsize
    itemsize_t = jnp.dtype(target.dtype).itemsize
    max_item = max(itemsize_o, itemsize_t)
    min_item = min(itemsize_o, itemsize_t)

    # Dtype-aware tiling: sublane multiple follows sub-32-bit packing
    # (8 for f32, 16 for bf16, 32 for int8/fp8); keep the tile ~constant in
    # BYTES (f32-equivalent `tile_rows`) so bf16/int8 stream the same roofline.
    sub = max(8, 32 // min_item)
    eff_tile_rows = max(sub, ((tile_rows * 4 // max_item) // sub) * sub)

    rows = n // LANE
    rem = n % LANE

    # Largest sub-multiple tile such that every split runs at least one step.
    max_tr = (rows // (num_split * sub)) * sub
    tr = min(eff_tile_rows, max_tr)

    if tr == 0:
        # Too small for even one (sub, 128) tile per split: pure-XLA fallback.
        d = o_flat.astype(jnp.float32) - t_flat.astype(jnp.float32)
        return jnp.sum(jnp.abs(d))

    steps = rows // (num_split * tr)
    bulk_rows = num_split * steps * tr
    bulk_elems = bulk_rows * LANE

    if rem == 0:
        # Zero-copy path: pass the FULL (rows, 128) arrays; the kernel grid only
        # addresses the first bulk_rows rows, so every block is fully in-bounds
        # and no pad / slice copy of the inputs is ever materialized.
        o2d = o_flat.reshape(rows, LANE)
        t2d = t_flat.reshape(rows, LANE)
    else:
        # Sub-128-element remainder: a single prefix slice is required to form
        # the lane-dense bulk.  (No jnp.pad; the remainder is summed below.)
        # TODO(synk): could be made fully copy-free with 1-D blocks + in-kernel
        # masking via scalar prefetch, at higher lowering risk.
        o2d = o_flat[:bulk_elems].reshape(bulk_rows, LANE)
        t2d = t_flat[:bulk_elems].reshape(bulk_rows, LANE)

    # VMEM budget: 2 inputs x 2 pipeline buffers x tile, plus headroom.
    # Cap well below v7x's 64 MiB/TC; above v5e's 16 MiB default scoped limit.
    tile_bytes = tr * LANE * max_item
    vmem_limit = min(max(4 * tile_bytes + (8 << 20), 16 << 20), 48 << 20)

    partials = pl.pallas_call(
        _abs_diff_partial_kernel,
        out_shape=jax.ShapeDtypeStruct((num_split * 8, LANE), jnp.float32),
        grid_spec=pltpu.PrefetchScalarGridSpec(
            num_scalar_prefetch=0,
            grid=(num_split, steps),
            in_specs=[
                pl.BlockSpec((tr, LANE), lambda p, i: (p * steps + i, 0)),
                pl.BlockSpec((tr, LANE), lambda p, i: (p * steps + i, 0)),
            ],
            out_specs=pl.BlockSpec((8, LANE), lambda p, i: (p, 0)),
        ),
        compiler_params=pltpu.CompilerParams(
            # Split across TensorCores on v7x; reduction axis stays "arbitrary".
            # TODO(synk): if xprof shows one TC doing all steps on v7x, switch
            # the first axis to pltpu.CORE_PARALLEL.
            dimension_semantics=("parallel", "arbitrary"),
            vmem_limit_bytes=int(vmem_limit),
        ),
    )(o2d, t2d)

    # Tiny (num_split*8, 128) final reduction — negligible next to the stream.
    total = jnp.sum(partials)

    # Row-tail / sub-row remainder not covered by the kernel grid.
    if bulk_elems < n:
        o_tail = o_flat[bulk_elems:].astype(jnp.float32)
        t_tail = t_flat[bulk_elems:].astype(jnp.float32)
        total = total + jnp.sum(jnp.abs(o_tail - t_tail))

    return total


if __name__ == "__main__":
    key = jax.random.PRNGKey(0)
    k1, k2 = jax.random.split(key)

    # Small NCHW-like shapes consistent with the PyTorch module's usage.
    output = jax.random.normal(k1, (2, 4, 16, 16), dtype=jnp.float32)
    target = jax.random.normal(k2, (2, 4, 16, 16), dtype=jnp.float32)

    loss = euclidian_loss(output, target)
    loss = jax.block_until_ready(loss)

    # The PyTorch module prints the loss; mirror that here.
    print(loss)

    # Silent correctness check against the pure-JAX reference.
    ref = jnp.sum(jnp.sqrt((output - target) ** 2))
    assert jnp.allclose(loss, ref, rtol=1e-5, atol=1e-5), (loss, ref)

    # Ragged (unaligned) path: element count not a multiple of 128.
    k3, k4 = jax.random.split(k2)
    o2 = jax.random.normal(k3, (3, 5, 7, 11), dtype=jnp.float32)
    t2 = jax.random.normal(k4, (3, 5, 7, 11), dtype=jnp.float32)
    loss2 = jax.block_until_ready(euclidian_loss(o2, t2))
    ref2 = jnp.sum(jnp.abs(o2 - t2))
    assert jnp.allclose(loss2, ref2, rtol=1e-5, atol=1e-5), (loss2, ref2)

    # Medium 128-aligned input: exercises the zero-copy bulk + multi-step
    # accumulation path (16384 rows -> >1 grid step at the default tile).
    k5, k6 = jax.random.split(k4)
    o3 = jax.random.normal(k5, (16, 16, 64, 128), dtype=jnp.float32)
    t3 = jax.random.normal(k6, (16, 16, 64, 128), dtype=jnp.float32)
    loss3 = jax.block_until_ready(euclidian_loss(o3, t3))
    ref3 = jnp.sum(jnp.abs(o3 - t3))
    assert jnp.allclose(loss3, ref3, rtol=1e-4, atol=1e-4), (loss3, ref3)

    # TODO(synk): `loss.requires_grad = True` is a PyTorch autograd attribute with no
    # Pallas/JAX equivalent; gradients in JAX come from jax.grad over the wrapper.
    print("KERNEL_OK")
</pallas_src>

<mosaic_0001>
module attributes {stable_mosaic.version = 11 : i64} {
  func.func @_abs_diff_partial_kernel(%arg0: i32, %arg1: i32, %arg2: memref<16x128xf32, #tpu.memory_space<vmem>>, %arg3: memref<16x128xf32, #tpu.memory_space<vmem>>, %arg4: memref<8x128xf32, #tpu.memory_space<vmem>>) attributes {dimension_semantics = [#tpu.dimension_semantics<parallel>, #tpu.dimension_semantics<arbitrary>], iteration_bounds = array<i64: 1, 1>, scalar_prefetch = 0 : i64, scratch_operands = 0 : i64, tpu.core_type = #tpu.core_type<tc>, window_params = [{transform_indices = @transform_0, window_bounds = array<i64: 16, 128>}, {transform_indices = @transform_1, window_bounds = array<i64: 16, 128>}, {transform_indices = @transform_2, window_bounds = array<i64: 8, 128>}]} {
    %c0_i32 = arith.constant 0 : i32
    %0 = arith.cmpi eq, %arg1, %c0_i32 : i32
    %1 = arith.extui %0 : i1 to i32
    %c0_i32_0 = arith.constant 0 : i32
    %2 = arith.cmpi ne, %1, %c0_i32_0 : i32
    scf.if %2 {
      %cst_8 = arith.constant 0.000000e+00 : f32
      %12 = vector.broadcast %cst_8 : f32 to vector<8x128xf32>
      %c0_9 = arith.constant 0 : index
      %c0_10 = arith.constant 0 : index
      %13 = vector.load %arg4[%c0_9, %c0_10] : memref<8x128xf32, #tpu.memory_space<vmem>>, vector<8x128xf32>
      tpu.vector_store %arg4[%c0_9, %c0_10], %12 {strides = array<i32>} : memref<8x128xf32, #tpu.memory_space<vmem>>, vector<8x128xf32>,
    } else {
    }
    %c0 = arith.constant 0 : index
    %c0_1 = arith.constant 0 : index
    %3 = vector.load %arg2[%c0, %c0_1] : memref<16x128xf32, #tpu.memory_space<vmem>>, vector<16x128xf32>
    %c0_2 = arith.constant 0 : index
    %c0_3 = arith.constant 0 : index
    %4 = vector.load %arg3[%c0_2, %c0_3] : memref<16x128xf32, #tpu.memory_space<vmem>>, vector<16x128xf32>
    %5 = arith.subf %3, %4 : vector<16x128xf32>
    %6 = math.absf %5 : vector<16x128xf32>
    %c0_4 = arith.constant 0 : index
    %c0_5 = arith.constant 0 : index
    %7 = vector.load %arg4[%c0_4, %c0_5] : memref<8x128xf32, #tpu.memory_space<vmem>>, vector<8x128xf32>
    %8 = vector.shape_cast %6 : vector<16x128xf32> to vector<2x8x128xf32>
    %cst = arith.constant dense<0.000000e+00> : vector<8x128xf32>
    %9 = vector.multi_reduction <add>, %8, %cst [0] : vector<2x8x128xf32> to vector<8x128xf32>
    %10 = arith.addf %7, %9 : vector<8x128xf32>
    %c0_6 = arith.constant 0 : index
    %c0_7 = arith.constant 0 : index
    %11 = vector.load %arg4[%c0_6, %c0_7] : memref<8x128xf32, #tpu.memory_space<vmem>>, vector<8x128xf32>
    tpu.vector_store %arg4[%c0_6, %c0_7], %10 {strides = array<i32>} : memref<8x128xf32, #tpu.memory_space<vmem>>, vector<8x128xf32>,
    return
  }
  func.func @transform_0(%arg0: i32, %arg1: i32) -> (i32, i32) {
    %c1_i32 = arith.constant 1 : i32
    %0 = arith.muli %arg0, %c1_i32 : i32
    %1 = arith.addi %0, %arg1 : i32
    %c0_i32 = arith.constant 0 : i32
    %c0_i32_0 = arith.constant 0 : i32
    return %1, %c0_i32 : i32, i32
  }
  func.func @transform_1(%arg0: i32, %arg1: i32) -> (i32, i32) {
    %c1_i32 = arith.constant 1 : i32
    %0 = arith.muli %arg0, %c1_i32 : i32
    %1 = arith.addi %0, %arg1 : i32
    %c0_i32 = arith.constant 0 : i32
    %c0_i32_0 = arith.constant 0 : i32
    return %1, %c0_i32 : i32, i32
  }
  func.func @transform_2(%arg0: i32, %arg1: i32) -> (i32, i32) {
    %c0_i32 = arith.constant 0 : i32
    %c0_i32_0 = arith.constant 0 : i32
    return %arg0, %c0_i32 : i32, i32
  }
}

</mosaic_0001>

<bundles_post_ra>
// kernel: tpu_custom_call.1
= control target key start
LH: loop header
LB: loop body
LE: loop exit
PB: predicated region body
PF: predicated region fallthrough
CT: control target
= control target key end

     0   :  { %7 = vsyncpa [#allocation3], 0  ;;  %s186_s0 = inlined_call_operand.hbm [shape: f32[16,128], index: 0, kind: input, shape index: {}]   ;;  %s187_s1 = inlined_call_operand.hbm [shape: f32[16,128], index: 1, kind: input, shape index: {}]   ;;  %s188_s2 = inlined_call_operand.hbm [shape: f32[8,128], index: 2, kind: output, shape index: {}]  }
   0x1   :  { %8 = vsyncpa [#allocation6], 0 }
   0x2   :  { %9 = vsyncpa [#allocation4], 0  ;;  %s157_s9 = smov [#allocation2]  }
   0x3   :  { %s19_s10 = sshll.u32 %s157_s9, 4  ;;  %s20_s10 = int_to_ptr.vmem [resolvable:$true] %s19_s10 }
   0x4   :  { %s99_s11 = scalar_lea.vmem %s20_s10, 256  ;;  %p104_p1 = scmp.lt.s32.totalorder %s20_s10, %s20_s10 }
   0x5   :  { %p100_p0 = scmp.ne.s32.totalorder %s20_s10, %s99_s11  ;;  %p105_p2 = scmp.lt.s32.totalorder %s99_s11, %s99_s11 }
   0x7   :  { %p106_p3 = por %p105_p2, %p104_p1 }
   0x9   :  { %p107_p4 = pnand %p106_p3, %p100_p0 }
   0xb   :  { %110 = shalt.err (!%p107_p4)
}
   0xc   :  { %s158_s12 = smov 128   ;;  %s159_s13 = smov 8  }
   0xd   :  { %25 = dma.hbm_to_vmem [thread:$0]  %s186_s0, 256, %s20_s10, [#allocation3], %s158_s12, %s158_s12, %s159_s13  }
   0xe   :  { %s160_s16 = smov [#allocation5]  }
   0xf   :  { %s35_s17 = sshll.u32 %s160_s16, 4  ;;  %s36_s17 = int_to_ptr.vmem [resolvable:$true] %s35_s17 }
  0x10   :  { %s119_s18 = scalar_lea.vmem %s36_s17, 256  ;;  %p124_p6 = scmp.lt.s32.totalorder %s36_s17, %s36_s17 }
  0x11   :  { %p120_p5 = scmp.ne.s32.totalorder %s36_s17, %s119_s18  ;;  %p125_p7 = scmp.lt.s32.totalorder %s119_s18, %s119_s18 }
  0x13   :  { %p126_p8 = por %p125_p7, %p124_p6 }
  0x15   :  { %p127_p9 = pnand %p126_p8, %p120_p5 }
  0x17   :  { %130 = shalt.err (!%p127_p9)
}
  0x18   :  { %41 = dma.hbm_to_vmem [thread:$0]  %s187_s1, 256, %s36_s17, [#allocation6], %s158_s12, %s158_s12, %s159_s13  }
  0x19   :  { %151 = dma.done.wait [#allocation3], 256  }
  0x1a   :  { %152 = vsyncadd [#allocation3], 4294967040 }
  0x1b   :  { %153 = dma.done.wait [#allocation6], 256  }
  0x1c   :  { %154 = vsyncadd [#allocation6], 4294967040  ;;  %v57_v0 = vld [vmem:[#allocation2] sm:$0xff]  ;;  %v58_v1 = vld [vmem:[#allocation2 + $0x8] sm:$0xff]  ;;  %s161_s0 = smov [#allocation7]  }
  0x1d   :  { %v59_v2 = vld [vmem:[#allocation5] sm:$0xff]  ;;  %v60_v3 = vld [vmem:[#allocation5 + $0x8] sm:$0xff]  ;;  %s75_s21 = sshll.u32 %s161_s0, 4  ;;  %s76_s21 = int_to_ptr.vmem [resolvable:$true] %s75_s21 }
  0x1e   :  { %v61_v4 = vsub.f32 %v57_v0, %v59_v2  ;;  %v62_v5 = vsub.f32 %v58_v1, %v60_v3  ;;  %s131_s22 = scalar_lea.vmem %s76_s21, 128  ;;  %p136_p11 = scmp.lt.s32.totalorder %s76_s21, %s76_s21 }
  0x1f   :  { %p132_p10 = scmp.ne.s32.totalorder %s76_s21, %s131_s22  ;;  %p137_p12 = scmp.lt.s32.totalorder %s131_s22, %s131_s22 }
  0x20   :  { %v63_v6 = vand.u32 2147483647, %v61_v4  ;;  %v64_v7 = vand.u32 2147483647, %v62_v5 }
  0x21   :  { %p138_p13 = por %p137_p12, %p136_p11 }
  0x22   :  { %v66_v8 = vadd.f32 %v64_v7, %v63_v6 }
  0x23   :  { %p139_p0 = pnand %p138_p13, %p132_p10 }
  0x24   :  { %68 = vst [vmem:[#allocation7] sm:$0xff] %v66_v8 }
  0x25   :  { %142 = shalt.err (!%p139_p0)
}
  0x26   :  { %78 = dma.vmem_to_hbm [thread:$0]  %s76_s21, 128, %s188_s2, [#allocation4]  }
  0x27   :  { %155 = dma.done.wait [#allocation4], 128  }
  0x28   :  { %156 = vsyncadd [#allocation4], 4294967168 }
  0x29   :  { %82 = vsyncpa [#allocation3], 1 }
  0x2a   :  { %83 = vsyncpa [#allocation6], 1 }
  0x2b   :  { %84 = vsyncpa [#allocation4], 1 }

</bundles_post_ra>
